<compile_context>
chip_gen: v5e
topology: v5e:2x2
jax: 0.10.0
libtpu: 0.0.40
codegen_flags: <defaults>
</compile_context>

<pallas_src>
import functools

import jax
import jax.numpy as jnp
from jax.experimental import pallas as pl
from jax.experimental.pallas import tpu as pltpu


IGNORE_INDEX = 255


def _seg_ce_kernel(logits_ref, tgt_ref, nll_ref, cnt_ref, *,
                   ignore_index, pb_total, tile_rows, n_inner, mask_tail):
    """Partial weighted-CE sums for one (image, pixel-row-tile) block.

    logits_ref: (C, TS, 128)  logits tile (input dtype; upcast per-class).
    tgt_ref:    (TS, 128)     int32 labels tile.
    nll_ref:    (CP, 128) f32 accumulator: sum of -log p[target] per class.
    cnt_ref:    (CP, 128) f32 accumulator: valid-pixel count per class.
    Accumulators are resident across the inner (reduction) grid axis.
    """
    C = logits_ref.shape[0]
    CP = nll_ref.shape[0]

    @pl.when(pl.program_id(2) == 0)
    def _():
        nll_ref[...] = jnp.zeros_like(nll_ref)
        cnt_ref[...] = jnp.zeros_like(cnt_ref)

    tgt = tgt_ref[...]                                 # (TS, 128) int32
    valid = tgt != ignore_index
    if mask_tail:
        # Rows past the end of the (possibly clamped / ragged) pixel array
        # hold unspecified data: mask them by *logical* row index.  Only
        # emitted when a tail can actually exist for this configuration.
        tile_idx = pl.program_id(1) * n_inner + pl.program_id(2)
        row = tile_idx * tile_rows + jax.lax.broadcasted_iota(
            jnp.int32, tgt.shape, 0)
        valid = jnp.logical_and(valid, row < pb_total)

    # Per-pixel logsumexp over classes in f32, unrolled over the small static
    # C: pure 2-D VPU/EUP work on dense (TS, 128) tiles.  Per-class slices are
    # re-read from VMEM instead of materialising a full-block f32 copy.
    # TODO(synk): for large alphabets (C ~ 30+) switch to an online
    # (running-max) logsumexp / lax.fori_loop to bound vreg pressure.
    x0 = logits_ref[0].astype(jnp.float32)
    m = x0
    for c in range(1, C):
        m = jnp.maximum(m, logits_ref[c].astype(jnp.float32))
    se = jnp.exp(x0 - m)
    for c in range(1, C):
        se = se + jnp.exp(logits_ref[c].astype(jnp.float32) - m)
    lse = m + jnp.log(se)                              # (TS, 128)

    # Per-class masked sums, reduced over sublanes to lane-dense (1, 128)
    # rows, then ONE whole-block accumulate per output (no per-class sublane
    # read-modify-writes).
    nll_rows = []
    cnt_rows = []
    for c in range(C):
        mask_c = jnp.logical_and(tgt == c, valid)
        x_c = logits_ref[c].astype(jnp.float32)
        # -log softmax[c] = lse - logit_c ; use where (select) so NaN/Inf from
        # garbage tail rows can never leak into the sums.
        contrib = jnp.where(mask_c, lse - x_c, 0.0)
        nll_rows.append(jnp.sum(contrib, axis=0, keepdims=True))
        cnt_rows.append(jnp.sum(mask_c.astype(jnp.float32), axis=0,
                                keepdims=True))
    if CP > C:
        pad = jnp.zeros((CP - C, tgt.shape[1]), jnp.float32)
        nll_rows.append(pad)
        cnt_rows.append(pad)
    nll_ref[...] += jnp.concatenate(nll_rows, axis=0)
    cnt_ref[...] += jnp.concatenate(cnt_rows, axis=0)


def seg_loss(seg_map, seg_target, *, seg_with_loss_weight=True,
             ignore_index=IGNORE_INDEX, tile_rows=None,
             vmem_block_bytes=4 * 1024 * 1024):
    """seg_map: (N, C, H, W) float logits, seg_target: (N, H, W) int labels."""
    N, C, H, W = seg_map.shape
    P = H * W
    Pb = pl.cdiv(P, 128)          # pixel rows of 128 lanes
    P_pad = Pb * 128
    CP = pl.cdiv(C, 8) * 8        # class rows padded to 8 sublanes

    logits = seg_map.reshape(N, C, P)
    target = seg_target.astype(jnp.int32).reshape(N, P)
    if P_pad != P:
        # Only hit when H*W is not a multiple of 128 (costs one pad copy).
        logits = jnp.pad(logits, ((0, 0), (0, 0), (0, P_pad - P)))
        target = jnp.pad(target, ((0, 0), (0, P_pad - P)),
                         constant_values=ignore_index)
    logits = logits.reshape(N, C, Pb, 128)
    target = target.reshape(N, Pb, 128)

    # --- pixel-row tile size (multiples of 8 sublanes, VMEM-budgeted) ---
    if tile_rows is None:
        per_row_bytes = 128 * (C * seg_map.dtype.itemsize + 4)
        ts = max(int(vmem_block_bytes) // per_row_bytes, 8)
    else:
        ts = int(tile_rows)
    ts = max((ts // 8) * 8, 8)
    if ts >= Pb:
        ts = Pb                   # full extent (no divisibility constraint)

    n_tiles = pl.cdiv(Pb, ts)
    # Give the v7x megacore a parallel axis even when the batch is tiny.
    n_outer = 2 if (N == 1 and n_tiles >= 2) else 1
    n_inner = pl.cdiv(n_tiles, n_outer)
    mask_tail = (n_outer * n_inner * ts) > Pb
    clamp = (n_outer * n_inner) > n_tiles

    def tile_index(o, i):
        t = o * n_inner + i
        if clamp:                 # duplicated tile; its rows are masked out
            t = jnp.minimum(t, n_tiles - 1)
        return t

    kernel = functools.partial(
        _seg_ce_kernel, ignore_index=ignore_index, pb_total=Pb,
        tile_rows=ts, n_inner=n_inner, mask_tail=mask_tail)

    nll_part, cnt_part = pl.pallas_call(
        kernel,
        out_shape=(jax.ShapeDtypeStruct((N, n_outer, CP, 128), jnp.float32),
                   jax.ShapeDtypeStruct((N, n_outer, CP, 128), jnp.float32)),
        grid_spec=pltpu.PrefetchScalarGridSpec(
            num_scalar_prefetch=0,
            grid=(N, n_outer, n_inner),
            in_specs=[
                pl.BlockSpec((None, C, ts, 128),
                             lambda n, o, i: (n, 0, tile_index(o, i), 0)),
                pl.BlockSpec((None, ts, 128),
                             lambda n, o, i: (n, tile_index(o, i), 0)),
            ],
            out_specs=(
                pl.BlockSpec((None, None, CP, 128),
                             lambda n, o, i: (n, o, 0, 0)),
                pl.BlockSpec((None, None, CP, 128),
                             lambda n, o, i: (n, o, 0, 0)),
            )),
        compiler_params=pltpu.CompilerParams(
            dimension_semantics=("parallel", "parallel", "arbitrary"),
            vmem_limit_bytes=48 * 1024 * 1024),
    )(logits, target)

    nll_c = jnp.sum(nll_part, axis=(0, 1, 3))[:C]   # (C,) sum -log p[target]
    cnt_c = jnp.sum(cnt_part, axis=(0, 1, 3))[:C]   # (C,) valid pixels

    n_valid = jnp.sum(cnt_c)
    n_neg = cnt_c[0]
    if seg_with_loss_weight:
        # NOTE: matches PyTorch exactly, including the divide-by-zero hazard
        # when there are no positive valid pixels.
        weight_val = 1.0 * n_neg / (n_valid - n_neg)
        w = jnp.ones((C,), jnp.float32).at[1:].set(weight_val)
    else:
        w = jnp.ones((C,), jnp.float32)

    # PyTorch weighted cross_entropy 'mean' reduction.
    loss_seg = jnp.sum(w * nll_c) / jnp.sum(w * cnt_c)
    return {"loss_seg": loss_seg}


def _reference_loss(seg_map, seg_target, ignore_index=IGNORE_INDEX):
    """Plain-JAX reference of weighted F.cross_entropy for validation."""
    N, C, H, W = seg_map.shape
    logits = jnp.transpose(seg_map, (0, 2, 3, 1)).reshape(-1, C).astype(jnp.float32)
    tgt = seg_target.reshape(-1)
    valid = tgt != ignore_index
    n_valid = jnp.sum(valid)
    n_neg = jnp.sum((tgt == 0) & valid)
    weight_val = 1.0 * n_neg / (n_valid - n_neg)
    w = jnp.ones((C,), jnp.float32).at[1:].set(weight_val)
    logp = jax.nn.log_softmax(logits, axis=-1)
    tgt_safe = jnp.where(valid, tgt, 0)
    nll = -jnp.take_along_axis(logp, tgt_safe[:, None], axis=-1)[:, 0]
    wt = w[tgt_safe] * valid.astype(jnp.float32)
    return jnp.sum(wt * nll) / jnp.sum(wt)


def _make_case(key, N, C, H, W, dtype=jnp.float32):
    k1, k2, k3 = jax.random.split(key, 3)
    logits = jax.random.normal(k1, (N, C, H, W), dtype=jnp.float32).astype(dtype)
    tgt = jax.random.randint(k2, (N, H, W), 0, C, dtype=jnp.int32)
    ignore = jax.random.uniform(k3, (N, H, W)) < 0.1
    tgt = jnp.where(ignore, IGNORE_INDEX, tgt)
    return logits, tgt


if __name__ == "__main__":
    key = jax.random.PRNGKey(0)
    keys = jax.random.split(key, 5)

    # TODO(synk): BitmapMasks.rescale / to_tensor (PIL/opencv resize of the GT
    # masks) has no Pallas equivalent; the kernel consumes an already-rescaled
    # label map.

    # 1) Base config: out_head logits (N, C, H, W); H*W is a multiple of 128.
    out_head, seg_target = _make_case(keys[0], 2, 4, 16, 16)
    losses = seg_loss(out_head, seg_target)
    loss = jax.block_until_ready(losses["loss_seg"])
    ref = jax.block_until_ready(_reference_loss(out_head, seg_target))
    assert jnp.allclose(loss, ref, rtol=1e-5, atol=1e-5), (loss, ref)

    # 2) N=1 with forced small tiles: exercises the megacore (outer) split
    #    with a clamped/ragged tail masked in-kernel.
    out2, tgt2 = _make_case(keys[1], 1, 4, 40, 48)
    loss2 = jax.block_until_ready(seg_loss(out2, tgt2, tile_rows=8)["loss_seg"])
    ref2 = jax.block_until_ready(_reference_loss(out2, tgt2))
    assert jnp.allclose(loss2, ref2, rtol=1e-5, atol=1e-5), (loss2, ref2)

    # 3) H*W not a multiple of 128: exercises the wrapper pad path
    #    (target padded with ignore_index).
    out3, tgt3 = _make_case(keys[2], 2, 4, 12, 20)
    loss3 = jax.block_until_ready(seg_loss(out3, tgt3)["loss_seg"])
    ref3 = jax.block_until_ready(_reference_loss(out3, tgt3))
    assert jnp.allclose(loss3, ref3, rtol=1e-5, atol=1e-5), (loss3, ref3)

    # 4) Multiple inner (reduction) tiles: exercises accumulation across the
    #    "arbitrary" grid axis with resident accumulators.
    out4, tgt4 = _make_case(keys[3], 2, 4, 64, 32)
    loss4 = jax.block_until_ready(seg_loss(out4, tgt4, tile_rows=8)["loss_seg"])
    ref4 = jax.block_until_ready(_reference_loss(out4, tgt4))
    assert jnp.allclose(loss4, ref4, rtol=1e-5, atol=1e-5), (loss4, ref4)

    # 5) bf16 logits: exercises the per-class upcast path (no full f32 block).
    out5, tgt5 = _make_case(keys[4], 2, 4, 32, 32, dtype=jnp.bfloat16)
    loss5 = jax.block_until_ready(seg_loss(out5, tgt5)["loss_seg"])
    ref5 = jax.block_until_ready(_reference_loss(out5, tgt5))
    assert jnp.allclose(loss5, ref5, rtol=1e-4, atol=1e-5), (loss5, ref5)

    print("KERNEL_OK")
</pallas_src>

<mosaic_0001>
module attributes {stable_mosaic.version = 11 : i64} {
  func.func @_seg_ce_kernel(%arg0: i32, %arg1: i32, %arg2: i32, %arg3: memref<1x4x2x128xf32, #tpu.memory_space<vmem>>, %arg4: memref<1x2x128xi32, #tpu.memory_space<vmem>>, %arg5: memref<1x1x8x128xf32, #tpu.memory_space<vmem>>, %arg6: memref<1x1x8x128xf32, #tpu.memory_space<vmem>>) attributes {dimension_semantics = [#tpu.dimension_semantics<parallel>, #tpu.dimension_semantics<parallel>, #tpu.dimension_semantics<arbitrary>], iteration_bounds = array<i64: 2, 1, 1>, scalar_prefetch = 0 : i64, scratch_operands = 0 : i64, tpu.core_type = #tpu.core_type<tc>, window_params = [{transform_indices = @transform_0, window_bounds = array<i64: 1, 4, 2, 128>}, {transform_indices = @transform_1, window_bounds = array<i64: 1, 2, 128>}, {transform_indices = @transform_2, window_bounds = array<i64: 1, 1, 8, 128>}, {transform_indices = @transform_3, window_bounds = array<i64: 1, 1, 8, 128>}]} {
    %c0_i32 = arith.constant 0 : i32
    %0 = arith.cmpi eq, %arg2, %c0_i32 : i32
    %1 = arith.extui %0 : i1 to i32
    %c0_i32_0 = arith.constant 0 : i32
    %2 = arith.cmpi ne, %1, %c0_i32_0 : i32
    scf.if %2 {
      %cst_73 = arith.constant 0.000000e+00 : f32
      %108 = vector.broadcast %cst_73 : f32 to vector<8x128xf32>
      %c0_74 = arith.constant 0 : index
      %c0_75 = arith.constant 0 : index
      %c0_76 = arith.constant 0 : index
      %c0_77 = arith.constant 0 : index
      %109 = vector.load %arg5[%c0_74, %c0_75, %c0_76, %c0_77] : memref<1x1x8x128xf32, #tpu.memory_space<vmem>>, vector<1x1x8x128xf32>
      %110 = vector.shape_cast %109 : vector<1x1x8x128xf32> to vector<8x128xf32>
      %111 = vector.shape_cast %108 : vector<8x128xf32> to vector<1x1x8x128xf32>
      tpu.vector_store %arg5[%c0_74, %c0_75, %c0_76, %c0_77], %111 {strides = array<i32>} : memref<1x1x8x128xf32, #tpu.memory_space<vmem>>, vector<1x1x8x128xf32>,
      %cst_78 = arith.constant 0.000000e+00 : f32
      %112 = vector.broadcast %cst_78 : f32 to vector<8x128xf32>
      %c0_79 = arith.constant 0 : index
      %c0_80 = arith.constant 0 : index
      %c0_81 = arith.constant 0 : index
      %c0_82 = arith.constant 0 : index
      %113 = vector.load %arg6[%c0_79, %c0_80, %c0_81, %c0_82] : memref<1x1x8x128xf32, #tpu.memory_space<vmem>>, vector<1x1x8x128xf32>
      %114 = vector.shape_cast %113 : vector<1x1x8x128xf32> to vector<8x128xf32>
      %115 = vector.shape_cast %112 : vector<8x128xf32> to vector<1x1x8x128xf32>
      tpu.vector_store %arg6[%c0_79, %c0_80, %c0_81, %c0_82], %115 {strides = array<i32>} : memref<1x1x8x128xf32, #tpu.memory_space<vmem>>, vector<1x1x8x128xf32>,
    } else {
    }
    %c0 = arith.constant 0 : index
    %c0_1 = arith.constant 0 : index
    %c0_2 = arith.constant 0 : index
    %3 = vector.load %arg4[%c0, %c0_1, %c0_2] : memref<1x2x128xi32, #tpu.memory_space<vmem>>, vector<1x2x128xi32>
    %4 = vector.shape_cast %3 : vector<1x2x128xi32> to vector<2x128xi32>
    %c255_i32 = arith.constant 255 : i32
    %5 = vector.broadcast %c255_i32 : i32 to vector<2x128xi32>
    %6 = arith.cmpi ne, %4, %5 : vector<2x128xi32>
    %c0_3 = arith.constant 0 : index
    %c0_4 = arith.constant 0 : index
    %c0_5 = arith.constant 0 : index
    %c0_6 = arith.constant 0 : index
    %7 = vector.load %arg3[%c0_3, %c0_4, %c0_5, %c0_6] : memref<1x4x2x128xf32, #tpu.memory_space<vmem>>, vector<1x1x2x128xf32>
    %8 = vector.shape_cast %7 : vector<1x1x2x128xf32> to vector<2x128xf32>
    %c0_7 = arith.constant 0 : index
    %c1 = arith.constant 1 : index
    %c0_8 = arith.constant 0 : index
    %c0_9 = arith.constant 0 : index
    %9 = vector.load %arg3[%c0_7, %c1, %c0_8, %c0_9] : memref<1x4x2x128xf32, #tpu.memory_space<vmem>>, vector<1x1x2x128xf32>
    %10 = vector.shape_cast %9 : vector<1x1x2x128xf32> to vector<2x128xf32>
    %11 = arith.maximumf %8, %10 : vector<2x128xf32>
    %c0_10 = arith.constant 0 : index
    %c2 = arith.constant 2 : index
    %c0_11 = arith.constant 0 : index
    %c0_12 = arith.constant 0 : index
    %12 = vector.load %arg3[%c0_10, %c2, %c0_11, %c0_12] : memref<1x4x2x128xf32, #tpu.memory_space<vmem>>, vector<1x1x2x128xf32>
    %13 = vector.shape_cast %12 : vector<1x1x2x128xf32> to vector<2x128xf32>
    %14 = arith.maximumf %11, %13 : vector<2x128xf32>
    %c0_13 = arith.constant 0 : index
    %c3 = arith.constant 3 : index
    %c0_14 = arith.constant 0 : index
    %c0_15 = arith.constant 0 : index
    %15 = vector.load %arg3[%c0_13, %c3, %c0_14, %c0_15] : memref<1x4x2x128xf32, #tpu.memory_space<vmem>>, vector<1x1x2x128xf32>
    %16 = vector.shape_cast %15 : vector<1x1x2x128xf32> to vector<2x128xf32>
    %17 = arith.maximumf %14, %16 : vector<2x128xf32>
    %18 = arith.subf %8, %17 : vector<2x128xf32>
    %19 = math.exp %18 : vector<2x128xf32>
    %c0_16 = arith.constant 0 : index
    %c1_17 = arith.constant 1 : index
    %c0_18 = arith.constant 0 : index
    %c0_19 = arith.constant 0 : index
    %20 = vector.load %arg3[%c0_16, %c1_17, %c0_18, %c0_19] : memref<1x4x2x128xf32, #tpu.memory_space<vmem>>, vector<1x1x2x128xf32>
    %21 = vector.shape_cast %20 : vector<1x1x2x128xf32> to vector<2x128xf32>
    %22 = arith.subf %21, %17 : vector<2x128xf32>
    %23 = math.exp %22 : vector<2x128xf32>
    %24 = arith.addf %19, %23 : vector<2x128xf32>
    %c0_20 = arith.constant 0 : index
    %c2_21 = arith.constant 2 : index
    %c0_22 = arith.constant 0 : index
    %c0_23 = arith.constant 0 : index
    %25 = vector.load %arg3[%c0_20, %c2_21, %c0_22, %c0_23] : memref<1x4x2x128xf32, #tpu.memory_space<vmem>>, vector<1x1x2x128xf32>
    %26 = vector.shape_cast %25 : vector<1x1x2x128xf32> to vector<2x128xf32>
    %27 = arith.subf %26, %17 : vector<2x128xf32>
    %28 = math.exp %27 : vector<2x128xf32>
    %29 = arith.addf %24, %28 : vector<2x128xf32>
    %c0_24 = arith.constant 0 : index
    %c3_25 = arith.constant 3 : index
    %c0_26 = arith.constant 0 : index
    %c0_27 = arith.constant 0 : index
    %30 = vector.load %arg3[%c0_24, %c3_25, %c0_26, %c0_27] : memref<1x4x2x128xf32, #tpu.memory_space<vmem>>, vector<1x1x2x128xf32>
    %31 = vector.shape_cast %30 : vector<1x1x2x128xf32> to vector<2x128xf32>
    %32 = arith.subf %31, %17 : vector<2x128xf32>
    %33 = math.exp %32 : vector<2x128xf32>
    %34 = arith.addf %29, %33 : vector<2x128xf32>
    %35 = math.log %34 : vector<2x128xf32>
    %36 = arith.addf %17, %35 : vector<2x128xf32>
    %c0_i32_28 = arith.constant 0 : i32
    %37 = vector.broadcast %c0_i32_28 : i32 to vector<2x128xi32>
    %38 = arith.cmpi eq, %4, %37 : vector<2x128xi32>
    %39 = arith.andi %38, %6 : vector<2x128xi1>
    %c0_29 = arith.constant 0 : index
    %c0_30 = arith.constant 0 : index
    %c0_31 = arith.constant 0 : index
    %c0_32 = arith.constant 0 : index
    %40 = vector.load %arg3[%c0_29, %c0_30, %c0_31, %c0_32] : memref<1x4x2x128xf32, #tpu.memory_space<vmem>>, vector<1x1x2x128xf32>
    %41 = vector.shape_cast %40 : vector<1x1x2x128xf32> to vector<2x128xf32>
    %42 = arith.subf %36, %41 : vector<2x128xf32>
    %cst = arith.constant 0.000000e+00 : f32
    %43 = vector.broadcast %cst : f32 to vector<2x128xf32>
    %44 = arith.select %39, %42, %43 : vector<2x128xi1>, vector<2x128xf32>
    %cst_33 = arith.constant dense<0.000000e+00> : vector<128xf32>
    %45 = vector.multi_reduction <add>, %44, %cst_33 [0] : vector<2x128xf32> to vector<128xf32>
    %46 = vector.shape_cast %45 : vector<128xf32> to vector<1x128xf32>
    %47 = arith.extui %39 : vector<2x128xi1> to vector<2x128xi32>
    %48 = arith.sitofp %47 : vector<2x128xi32> to vector<2x128xf32>
    %cst_34 = arith.constant dense<0.000000e+00> : vector<128xf32>
    %49 = vector.multi_reduction <add>, %48, %cst_34 [0] : vector<2x128xf32> to vector<128xf32>
    %50 = vector.shape_cast %49 : vector<128xf32> to vector<1x128xf32>
    %c1_i32 = arith.constant 1 : i32
    %51 = vector.broadcast %c1_i32 : i32 to vector<2x128xi32>
    %52 = arith.cmpi eq, %4, %51 : vector<2x128xi32>
    %53 = arith.andi %52, %6 : vector<2x128xi1>
    %c0_35 = arith.constant 0 : index
    %c1_36 = arith.constant 1 : index
    %c0_37 = arith.constant 0 : index
    %c0_38 = arith.constant 0 : index
    %54 = vector.load %arg3[%c0_35, %c1_36, %c0_37, %c0_38] : memref<1x4x2x128xf32, #tpu.memory_space<vmem>>, vector<1x1x2x128xf32>
    %55 = vector.shape_cast %54 : vector<1x1x2x128xf32> to vector<2x128xf32>
    %56 = arith.subf %36, %55 : vector<2x128xf32>
    %cst_39 = arith.constant 0.000000e+00 : f32
    %57 = vector.broadcast %cst_39 : f32 to vector<2x128xf32>
    %58 = arith.select %53, %56, %57 : vector<2x128xi1>, vector<2x128xf32>
    %cst_40 = arith.constant dense<0.000000e+00> : vector<128xf32>
    %59 = vector.multi_reduction <add>, %58, %cst_40 [0] : vector<2x128xf32> to vector<128xf32>
    %60 = vector.shape_cast %59 : vector<128xf32> to vector<1x128xf32>
    %61 = arith.extui %53 : vector<2x128xi1> to vector<2x128xi32>
    %62 = arith.sitofp %61 : vector<2x128xi32> to vector<2x128xf32>
    %cst_41 = arith.constant dense<0.000000e+00> : vector<128xf32>
    %63 = vector.multi_reduction <add>, %62, %cst_41 [0] : vector<2x128xf32> to vector<128xf32>
    %64 = vector.shape_cast %63 : vector<128xf32> to vector<1x128xf32>
    %c2_i32 = arith.constant 2 : i32
    %65 = vector.broadcast %c2_i32 : i32 to vector<2x128xi32>
    %66 = arith.cmpi eq, %4, %65 : vector<2x128xi32>
    %67 = arith.andi %66, %6 : vector<2x128xi1>
    %c0_42 = arith.constant 0 : index
    %c2_43 = arith.constant 2 : index
    %c0_44 = arith.constant 0 : index
    %c0_45 = arith.constant 0 : index
    %68 = vector.load %arg3[%c0_42, %c2_43, %c0_44, %c0_45] : memref<1x4x2x128xf32, #tpu.memory_space<vmem>>, vector<1x1x2x128xf32>
    %69 = vector.shape_cast %68 : vector<1x1x2x128xf32> to vector<2x128xf32>
    %70 = arith.subf %36, %69 : vector<2x128xf32>
    %cst_46 = arith.constant 0.000000e+00 : f32
    %71 = vector.broadcast %cst_46 : f32 to vector<2x128xf32>
    %72 = arith.select %67, %70, %71 : vector<2x128xi1>, vector<2x128xf32>
    %cst_47 = arith.constant dense<0.000000e+00> : vector<128xf32>
    %73 = vector.multi_reduction <add>, %72, %cst_47 [0] : vector<2x128xf32> to vector<128xf32>
    %74 = vector.shape_cast %73 : vector<128xf32> to vector<1x128xf32>
    %75 = arith.extui %67 : vector<2x128xi1> to vector<2x128xi32>
    %76 = arith.sitofp %75 : vector<2x128xi32> to vector<2x128xf32>
    %cst_48 = arith.constant dense<0.000000e+00> : vector<128xf32>
    %77 = vector.multi_reduction <add>, %76, %cst_48 [0] : vector<2x128xf32> to vector<128xf32>
    %78 = vector.shape_cast %77 : vector<128xf32> to vector<1x128xf32>
    %c3_i32 = arith.constant 3 : i32
    %79 = vector.broadcast %c3_i32 : i32 to vector<2x128xi32>
    %80 = arith.cmpi eq, %4, %79 : vector<2x128xi32>
    %81 = arith.andi %80, %6 : vector<2x128xi1>
    %c0_49 = arith.constant 0 : index
    %c3_50 = arith.constant 3 : index
    %c0_51 = arith.constant 0 : index
    %c0_52 = arith.constant 0 : index
    %82 = vector.load %arg3[%c0_49, %c3_50, %c0_51, %c0_52] : memref<1x4x2x128xf32, #tpu.memory_space<vmem>>, vector<1x1x2x128xf32>
    %83 = vector.shape_cast %82 : vector<1x1x2x128xf32> to vector<2x128xf32>
    %84 = arith.subf %36, %83 : vector<2x128xf32>
    %cst_53 = arith.constant 0.000000e+00 : f32
    %85 = vector.broadcast %cst_53 : f32 to vector<2x128xf32>
    %86 = arith.select %81, %84, %85 : vector<2x128xi1>, vector<2x128xf32>
    %cst_54 = arith.constant dense<0.000000e+00> : vector<128xf32>
    %87 = vector.multi_reduction <add>, %86, %cst_54 [0] : vector<2x128xf32> to vector<128xf32>
    %88 = vector.shape_cast %87 : vector<128xf32> to vector<1x128xf32>
    %89 = arith.extui %81 : vector<2x128xi1> to vector<2x128xi32>
    %90 = arith.sitofp %89 : vector<2x128xi32> to vector<2x128xf32>
    %cst_55 = arith.constant dense<0.000000e+00> : vector<128xf32>
    %91 = vector.multi_reduction <add>, %90, %cst_55 [0] : vector<2x128xf32> to vector<128xf32>
    %92 = vector.shape_cast %91 : vector<128xf32> to vector<1x128xf32>
    %cst_56 = arith.constant 0.000000e+00 : f32
    %93 = vector.broadcast %cst_56 : f32 to vector<4x128xf32>
    %c0_57 = arith.constant 0 : index
    %c0_58 = arith.constant 0 : index
    %c0_59 = arith.constant 0 : index
    %c0_60 = arith.constant 0 : index
    %94 = vector.load %arg5[%c0_57, %c0_58, %c0_59, %c0_60] : memref<1x1x8x128xf32, #tpu.memory_space<vmem>>, vector<1x1x8x128xf32>
    %95 = vector.shape_cast %94 : vector<1x1x8x128xf32> to vector<8x128xf32>
    %96 = tpu.concatenate %46, %60, %74, %88, %93 in 0 : vector<1x128xf32>, vector<1x128xf32>, vector<1x128xf32>, vector<1x128xf32>, vector<4x128xf32> -> vector<8x128xf32>
    %97 = arith.addf %95, %96 : vector<8x128xf32>
    %c0_61 = arith.constant 0 : index
    %c0_62 = arith.constant 0 : index
    %c0_63 = arith.constant 0 : index
    %c0_64 = arith.constant 0 : index
    %98 = vector.load %arg5[%c0_61, %c0_62, %c0_63, %c0_64] : memref<1x1x8x128xf32, #tpu.memory_space<vmem>>, vector<1x1x8x128xf32>
    %99 = vector.shape_cast %98 : vector<1x1x8x128xf32> to vector<8x128xf32>
    %100 = vector.shape_cast %97 : vector<8x128xf32> to vector<1x1x8x128xf32>
    tpu.vector_store %arg5[%c0_61, %c0_62, %c0_63, %c0_64], %100 {strides = array<i32>} : memref<1x1x8x128xf32, #tpu.memory_space<vmem>>, vector<1x1x8x128xf32>,
    %c0_65 = arith.constant 0 : index
    %c0_66 = arith.constant 0 : index
    %c0_67 = arith.constant 0 : index
    %c0_68 = arith.constant 0 : index
    %101 = vector.load %arg6[%c0_65, %c0_66, %c0_67, %c0_68] : memref<1x1x8x128xf32, #tpu.memory_space<vmem>>, vector<1x1x8x128xf32>
    %102 = vector.shape_cast %101 : vector<1x1x8x128xf32> to vector<8x128xf32>
    %103 = tpu.concatenate %50, %64, %78, %92, %93 in 0 : vector<1x128xf32>, vector<1x128xf32>, vector<1x128xf32>, vector<1x128xf32>, vector<4x128xf32> -> vector<8x128xf32>
    %104 = arith.addf %102, %103 : vector<8x128xf32>
    %c0_69 = arith.constant 0 : index
    %c0_70 = arith.constant 0 : index
    %c0_71 = arith.constant 0 : index
    %c0_72 = arith.constant 0 : index
    %105 = vector.load %arg6[%c0_69, %c0_70, %c0_71, %c0_72] : memref<1x1x8x128xf32, #tpu.memory_space<vmem>>, vector<1x1x8x128xf32>
    %106 = vector.shape_cast %105 : vector<1x1x8x128xf32> to vector<8x128xf32>
    %107 = vector.shape_cast %104 : vector<8x128xf32> to vector<1x1x8x128xf32>
    tpu.vector_store %arg6[%c0_69, %c0_70, %c0_71, %c0_72], %107 {strides = array<i32>} : memref<1x1x8x128xf32, #tpu.memory_space<vmem>>, vector<1x1x8x128xf32>,
    return
  }
  func.func @transform_0(%arg0: i32, %arg1: i32, %arg2: i32) -> (i32, i32, i32, i32) {
    %c1_i32 = arith.constant 1 : i32
    %0 = arith.muli %arg1, %c1_i32 : i32
    %1 = arith.addi %0, %arg2 : i32
    %c0_i32 = arith.constant 0 : i32
    %c0_i32_0 = arith.constant 0 : i32
    %c0_i32_1 = arith.constant 0 : i32
    return %arg0, %c0_i32, %1, %c0_i32_0 : i32, i32, i32, i32
  }
  func.func @transform_1(%arg0: i32, %arg1: i32, %arg2: i32) -> (i32, i32, i32) {
    %c1_i32 = arith.constant 1 : i32
    %0 = arith.muli %arg1, %c1_i32 : i32
    %1 = arith.addi %0, %arg2 : i32
    %c0_i32 = arith.constant 0 : i32
    %c0_i32_0 = arith.constant 0 : i32
    return %arg0, %1, %c0_i32 : i32, i32, i32
  }
  func.func @transform_2(%arg0: i32, %arg1: i32, %arg2: i32) -> (i32, i32, i32, i32) {
    %c0_i32 = arith.constant 0 : i32
    %c0_i32_0 = arith.constant 0 : i32
    %c0_i32_1 = arith.constant 0 : i32
    return %arg0, %arg1, %c0_i32, %c0_i32_0 : i32, i32, i32, i32
  }
  func.func @transform_3(%arg0: i32, %arg1: i32, %arg2: i32) -> (i32, i32, i32, i32) {
    %c0_i32 = arith.constant 0 : i32
    %c0_i32_0 = arith.constant 0 : i32
    %c0_i32_1 = arith.constant 0 : i32
    return %arg0, %arg1, %c0_i32, %c0_i32_0 : i32, i32, i32, i32
  }
}

</mosaic_0001>

<bundles_post_ra>
// kernel: tpu_custom_call.1
= control target key start
LH: loop header
LB: loop body
LE: loop exit
PB: predicated region body
PF: predicated region fallthrough
CT: control target
= control target key end

     0   :  { %9 = vsyncpa [#allocation3], 0  ;;  %s1149_s0 = inlined_call_operand.hbm [shape: f32[2,4,2,128], index: 0, kind: input, shape index: {}]   ;;  %s1150_s1 = inlined_call_operand.hbm [shape: s32[2,2,128], index: 1, kind: input, shape index: {}]   ;;  %s1151_s2 = inlined_call_operand.hbm [shape: f32[2,1,8,128], index: 2, kind: output, shape index: {0}]   ;;  %s1152_s3 = inlined_call_operand.hbm [shape: f32[2,1,8,128], index: 3, kind: output, shape index: {1}]  }
   0x1   :  { %11 = vsyncpa [#allocation3 + $0x1], 0 }
   0x2   :  { %12 = vsyncpa [#allocation6], 0 }
   0x3   :  { %14 = vsyncpa [#allocation6 + $0x1], 0 }
   0x4   :  { %15 = vsyncpa [#allocation4], 0 }
   0x5   :  { %17 = vsyncpa [#allocation4 + $0x1], 0 }
   0x6   :  { %18 = vsyncpa [#allocation9], 0 }
   0x7   :  { %20 = vsyncpa [#allocation9 + $0x1], 0  ;;  %s909_s12 = smov 0   ;;  %s911_s13 = smov 0  }
   0x8   :  { %s913_s14 = smov 0   ;;  %s915_s15 = smov 0  }
   0x9   :  { %s917_s16 = smov 0   ;;  %s919_s17 = smov 0  }
   0xa LB: > { %s593_s18 = sadd.s32 4294967295, %s884_s17   ;;  %s594_s19 = sadd.s32 4294967294, %s884_s17   ;;  %s884_s17 = sphi %s919_s17, %s26_s17   ;;  %s880_s16 = sphi %s917_s16, %s1170_s16   ;;  %s876_s15 = sphi %s915_s15, %s1169_s15   ;;  %s872_s14 = sphi %s913_s14, %s1168_s14   ;;  %s868_s13 = sphi %s911_s13, %s1167_s13   ;;  %s864_s12 = sphi %s909_s12, %s1166_s12  }
   0xb   : > { %s45_s20 = sadd.s32 1, %s880_s16  ;;  %s56_s21 = sadd.s32 1, %s872_s14 }
   0xc   : > { %p47_p0 = scmp.ge.s32.totalorder %s45_s20, 2  ;;  %p63_p1 = scmp.ne.s32.totalorder %s872_s14, %s868_s13 }
   0xd   : > { %p64_p2 = scmp.eq.s32.totalorder %s884_s17, 0  ;;  %p69_p3 = scmp.ne.s32.totalorder %s868_s13, %s864_s12 }
   0xe   : > { %s1172_s20 = smov (%p47_p0, %s45_s20), 0  ;;  %p70_p5 = scmp.eq.s32.totalorder %s593_s18, 0 }
   0xf   : > { %p950_p4 = por %p64_p2, %p63_p1  ;;  %s51_s23 = ssub.s32 %s880_s16, %s1172_s20 }
  0x10   : > { %p125_p6 = scmp.eq.s32.totalorder %s593_s18, 1  ;;  %p54_p7 = scmp.eq.s32.totalorder %s51_s23, 0 }
  0x11   : > { %p956_p8 = por %p70_p5, %p69_p3  ;;  %p131_p10 = scmp.eq.s32.totalorder %s594_s19, 1 }
  0x12   : > { %p960_p9 = por %p125_p6, %p63_p1  ;;  %p596_p12 = scmp.ge.s32.totalorder %s884_s17, 2 }
  0x13   : > { %s965_s26 = scalar_select %p54_p7, %s872_s14, %s56_s21  }
  0x14   : > { %p967_p11 = por %p131_p10, %p69_p3  ;;  %p643_p13 = scmp.lt.s32.totalorder %s884_s17, 2 }
  0x15   : > { %s179_s28 = sand.u32 1, %s872_s14   ;;  %s620_s30 = sshll.u32 %s880_s16, 3 }
  0x16   : > { %s597_s29 = sshll.u32 %s179_s28, 3  ;;  %s190_s6 = scalar_lea.hbm %s1149_s0, %s620_s30 }
  0x17   : > { %s183_s7 = scalar_lea.vmem [#allocation2], %s597_s29  ;;  %s191_s9 = sshll.u32 %s190_s6, 4  ;;  %s192_s9 = int_to_ptr.hbm [resolvable:$true] %s191_s9 }
  0x18   : > { %s193_s8 = sshll.u32 %s183_s7, 4  ;;  %p980_p0 = pnand %p643_p13, %p950_p4  ;;  %s194_s8 = int_to_ptr.vmem [resolvable:$true] %s193_s8 }
  0x19   : > { %p602_p1 = scmp.ge.s32.totalorder %s884_s17, 1  ;;  %s180_s11 = scalar_lea.sflag [#allocation3], %s179_s28 }
  0x1a   : > { %s886_s18 = smov 32   ;;  %s887_s19 = smov 2  }
  0x1b   : > { %632 = dma.hbm_to_vmem [thread:$0]  (!%p980_p0), %s192_s9, 128, %s194_s8, %s180_s11, %s886_s18, %s886_s18, %s887_s19  }
  0x1c   : > { %p222_p2 = scmp.lt.s32.totalorder %s884_s17, 3  ;;  %s600_s21 = sshll.u32 %s179_s28, 1 }
  0x1d   : > { %s601_s23 = sshll.u32 %s880_s16, 1  ;;  %s207_s4 = scalar_lea.vmem [#allocation5], %s600_s21 }
  0x1e   : > { %p223_p3 = pnand %p602_p1, %p222_p2  ;;  %s213_s22 = scalar_lea.hbm %s1150_s1, %s601_s23 }
  0x1f   : > { %s217_s5 = sshll.u32 %s207_s4, 4  ;;  %s215_s6 = sshll.u32 %s213_s22, 4  ;;  %s218_s5 = int_to_ptr.vmem [resolvable:$true] %s217_s5  ;;  %s216_s6 = int_to_ptr.hbm [resolvable:$true] %s215_s6 }
  0x20   : > { %s204_s7 = scalar_lea.sflag [#allocation6], %s179_s28  ;;  %226 = sbr.rel (%p223_p3) target bundleno = 101 (0x65), region = 28 }
  0x21   : > { %635 = dma.hbm_to_vmem [thread:$0]  (!%p980_p0), %s216_s6, 32, %s218_s5, %s204_s7  }
  0x22   : > { %s995_s8 = sand.u32 (!%p223_p3), 1, %s868_s13  }
  0x23   : > { %s998_s9 = sshll.u32 (!%p223_p3), %s995_s8, 3  ;;  %s229_s11 = scalar_lea.sflag (!%p223_p3), [#allocation3], %s995_s8 }
  0x24   : > { %s232_s18 = scalar_lea.vmem (!%p223_p3), [#allocation2], %s998_s9 }
  0x25   : > { %847 = dma.done.wait (%p956_p8), %s229_s11, 128  }
  0x26   : > { %849 = vsyncadd (%p956_p8), %s229_s11, 4294967168  ;;  %s604_s28 = sshll.u32 %s995_s8, 1  ;;  %s239_s10 = scalar_lea.sflag [#allocation6], %s995_s8 }
  0x27   : > { %s242_s19 = scalar_lea.vmem [#allocation5], %s604_s28 }
  0x28   : > { %851 = dma.done.wait (%p956_p8), %s239_s10, 32  }
  0x29   : > { %853 = vsyncadd (%p956_p8), %s239_s10, 4294967264  ;;  %v284_v0 = vld [vmem:[%s242_s19] sm:$0x3]  ;;  %v1012_v1 = vld [vmem:[%s232_s18] sm:$0x3]  ;;  %vm318_vm6 = vcmask 1041408  }
  0x2a   : > { %v1014_v2 = vld [vmem:[%s232_s18 + $0x2] sm:$0x3]  ;;  %vm285_vm0 = vcmp.ne.s32.totalorder %v284_v0, 255  ;;  %v1018_v4 = vld [vmem:[%s232_s18 + $0x4] sm:$0x3]  ;;  %vm314_vm1 = vcmp.eq.s32.totalorder %v284_v0, 0 }
  0x2b   : > { %v289_v3 = vmax.f32 %v1012_v1, %v1014_v2  ;;  %v1020_v5 = vld [vmem:[%s232_s18 + $0x6] sm:$0x3]  ;;  %vm1024_vm2 = vmand %vm314_vm1, %vm285_vm0  ;;  %vm335_vm3 = vcmp.eq.s32.totalorder %v284_v0, 1  ;;  %vm355_vm5 = vcmp.eq.s32.totalorder %v284_v0, 2  ;;  %v888_v10 = vmov 0.0   ;;  %s616_s24 = sshll.u32 %s876_s15, 3 }
  0x2c   : > { %vm1032_vm4 = vmand %vm335_vm3, %vm285_vm0  ;;  %v610_v11 = vsel %vm1024_vm2, 1.0, %v888_v10  ;;  %vm375_vm8 = vcmp.eq.s32.totalorder %v284_v0, 3  ;;  %vm396_vm10 = vcmask 1040384   ;;  %s444_s29 = scalar_lea.hbm %s1152_s3, %s616_s24  ;;  %vm399_vm11 = vcmask 1042432   ;;  %s275_s30 = scalar_lea.vmem [#allocation8], %s998_s9 }
  0x2d   : > { %v292_v6 = vmax.f32 %v289_v3, %v1018_v4  ;;  %v611_v12 = vsel %vm1032_vm4, 1.0, %v888_v10  ;;  %vm1041_vm7 = vmand %vm355_vm5, %vm285_vm0  ;;  %v328_v19 = vsel %vm318_vm6, %v610_v11, 0.0  ;;  %vm401_vm12 = vcmask 1043456   ;;  %s446_s22 = sshll.u32 %s275_s30, 4  ;;  %s448_s4 = sshll.u32 %s444_s29, 4  ;;  %s447_s22 = int_to_ptr.vmem [resolvable:$true] %s446_s22  ;;  %s449_s4 = int_to_ptr.hbm [resolvable:$true] %s448_s4 }
  0x2e   : > { %vm1054_vm9 = vmand %vm375_vm8, %vm285_vm0  ;;  %v348_v20 = vsel %vm318_vm6, %v611_v12, 0.0  ;;  %v612_v21 = vsel %vm1041_vm7, 1.0, %v888_v10  ;;  %v329_v27 = vrot.slane %v328_v19, 4  ;;  %s418_s5 = scalar_lea.sflag [#allocation9], %s995_s8  ;;  %s780_s6 = sshra.s32 %s449_s4, 4  ;;  %s781_s6 = int_to_ptr.hbm [resolvable:$true] %s780_s6 }
  0x2f   : > { %v1029_v8 = vmax.f32 %v292_v6, %v1020_v5  ;;  %v613_v22 = vsel %vm1054_vm9, 1.0, %v888_v10  ;;  %v349_v28 = vrot.slane %v348_v20, 4  ;;  %v368_v29 = vsel %vm318_vm6, %v612_v21, 0.0  ;;  %s782_s7 = scalar_lea.hbm %s781_s6, 8  ;;  %s786_s28 = scalar_lea.hbm %s1152_s3, 16 }
  0x30   : > { %v369_v30 = vrot.slane %v368_v29, 4  ;;  %v388_v31 = vsel %vm318_vm6, %v613_v22, 0.0  ;;  %v330_v32 = vadd.f32 %v329_v27, %v328_v19  ;;  %p783_p4 = scmp.ne.s32.totalorder %s781_s6, %s782_s7  ;;  %p787_p7 = scmp.lt.s32.totalorder %s781_s6, %s1152_s3 }
  0x31   : > { %v296_v14 = vsub.f32 %v1012_v1, %v1029_v8  ;;  %v299_v15 = vsub.f32 %v1014_v2, %v1029_v8  ;;  %v303_v16 = vsub.f32 %v1018_v4, %v1029_v8  ;;  %v307_v17 = vsub.f32 %v1020_v5, %v1029_v8  ;;  %p788_p8 = scmp.lt.s32.totalorder %s786_s28, %s782_s7 }
  0x32   : > { %v350_v33 = vadd.f32 %v349_v28, %v348_v20  ;;  %v389_v34 = vrot.slane %v388_v31, 4  ;;  %v370_v35 = vadd.f32 %v369_v30, %v368_v29  ;;  %v331_v36 = vrot.slane %v330_v32, 2  ;;  %p784_p5 = pnand %p783_p4, %p960_p9 }
  0x33   : > { %v297_v23 = vmul.f32 1.442695, %v296_v14  ;;  %v300_v24 = vmul.f32 1.442695, %v299_v15  ;;  %v304_v25 = vmul.f32 1.442695, %v303_v16  ;;  %p789_p10 = por %p788_p8, %p787_p7 }
  0x34   : > { %v308_v26 = vmul.f32 1.442695, %v307_v17  ;;  %v351_v37 = vrot.slane %v350_v33, 2  ;;  %v390_v38 = vadd.f32 %v389_v34, %v388_v31  ;;  %v371_v39 = vrot.slane %v370_v35, 2  ;;  %p785_p6 = pneg %p784_p5 }
  0x35   : > { %696 = vpow2.f32 %v297_v23  ;;  %v332_v40 = vadd.f32 %v331_v36, %v330_v32 }
  0x36   : > { %698 = vpow2.f32 %v300_v24  ;;  %v352_v41 = vadd.f32 %v351_v37, %v350_v33  ;;  %v391_v42 = vrot.slane %v390_v38, 2  ;;  %v372_v44 = vadd.f32 %v371_v39, %v370_v35  ;;  %p790_p13 = pnand %p789_p10, %p785_p6 }
  0x37   : > { %700 = vpow2.f32 %v304_v25  ;;  %v333_v46 = vrot.slane %v332_v40, 1 }
  0x38   : > { %702 = vpow2.f32 %v308_v26  ;;  %v353_v47 = vrot.slane %v352_v41, 1  ;;  %v392_v48 = vadd.f32 %v391_v42, %v390_v38  ;;  %v373_v51 = vrot.slane %v372_v44, 1 }
  0x39   : > { %v334_v53 = vadd.f32 %v333_v46, %v332_v40 }
  0x3a   : > { %v354_v54 = vadd.f32 %v353_v47, %v352_v41  ;;  %v393_v55 = vrot.slane %v392_v48, 1  ;;  %v374_v57 = vadd.f32 %v373_v51, %v372_v44 }
  0x3b   : > { %v697_v43 = vpop.eup %696 }
  0x3c   : > { %v699_v45 = vpop.eup %698  ;;  %v394_v58 = vadd.f32 %v393_v55, %v392_v48  ;;  %v406_v59 = vsel %vm396_vm10, %v334_v53, %v354_v54 }
  0x3d   : > { %v701_v49 = vpop.eup %700  ;;  %v302_v50 = vadd.f32 %v699_v45, %v697_v43  ;;  %v407_v61 = vsel %vm318_vm6, %v406_v59, %v374_v57 }
  0x3e   : > { %v703_v52 = vpop.eup %702  ;;  %v408_v62 = vsel %vm399_vm11, %v407_v61, %v394_v58 }
  0x3f   : > { %v306_v56 = vadd.f32 %v701_v49, %v302_v50  ;;  %v409_v63 = vsel %vm401_vm12, %v408_v62, 0.0 }
  0x40   : > { %411 = vst [vmem:[%s275_s30] sm:$0xff] %v409_v63 }
  0x41   : > { %v310_v60 = vadd.f32 %v703_v52, %v306_v56 }
  0x43   : > { %704 = vlog2.f32 %v310_v60 }
  0x44   : > { %793 = shalt.err (!%p790_p13)
}
  0x45   : > { %626 = dma.vmem_to_hbm [thread:$0]  (%p960_p9), %s447_s22, 128, %s449_s4, %s418_s5  }
  0x46   : > { %s429_s29 = scalar_lea.hbm %s1151_s2, %s616_s24  ;;  %s268_s30 = scalar_lea.vmem [#allocation7], %s998_s9 }
  0x47   : > { %s431_s22 = sshll.u32 %s268_s30, 4  ;;  %s433_s4 = sshll.u32 %s429_s29, 4  ;;  %s432_s22 = int_to_ptr.vmem [resolvable:$true] %s431_s22  ;;  %s434_s4 = int_to_ptr.hbm [resolvable:$true] %s433_s4 }
  0x48   : > { %s413_s15 = scalar_lea.sflag [#allocation4], %s995_s8  ;;  %s808_s5 = sshra.s32 %s434_s4, 4  ;;  %s809_s5 = int_to_ptr.hbm [resolvable:$true] %s808_s5 }
  0x49   : > { %v705_v0 = vpop.eup %704  ;;  %s810_s6 = scalar_lea.hbm %s809_s5, 8  ;;  %s814_s9 = scalar_lea.hbm %s1151_s2, 16 }
  0x4a   : > { %v312_v3 = vmul.f32 0.6931472, %v705_v0  ;;  %p811_p0 = scmp.ne.s32.totalorder %s809_s5, %s810_s6  ;;  %p815_p3 = scmp.lt.s32.totalorder %s809_s5, %s1151_s2 }
  0x4b   : > { %p816_p4 = scmp.lt.s32.totalorder %s814_s9, %s810_s6 }
  0x4c   : > { %v313_v6 = vadd.f32 %v312_v3, %v1029_v8  ;;  %p812_p1 = pnand %p811_p0, %p960_p9 }
  0x4d   : > { %p817_p5 = por %p816_p4, %p815_p3 }
  0x4e   : > { %v316_v10 = vsub.f32 %v313_v6, %v1012_v1  ;;  %v337_v11 = vsub.f32 %v313_v6, %v1014_v2  ;;  %v357_v12 = vsub.f32 %v313_v6, %v1018_v4  ;;  %v377_v14 = vsub.f32 %v313_v6, %v1020_v5  ;;  %p813_p2 = pneg %p812_p1 }
  0x50   : > { %v317_v15 = vsel %vm1024_vm2, %v316_v10, 0.0  ;;  %v338_v16 = vsel %vm1032_vm4, %v337_v11, 0.0  ;;  %v358_v17 = vsel %vm1041_vm7, %v357_v12, 0.0  ;;  %v378_v8 = vsel %vm1054_vm9, %v377_v14, 0.0  ;;  %p818_p6 = pnand %p817_p5, %p813_p2 }
  0x51   : > { %v319_v1 = vsel %vm318_vm6, %v317_v15, 0.0  ;;  %v339_v2 = vsel %vm318_vm6, %v338_v16, 0.0  ;;  %v359_v4 = vsel %vm318_vm6, %v358_v17, 0.0  ;;  %v379_v5 = vsel %vm318_vm6, %v378_v8, 0.0 }
  0x52   : > { %v320_v19 = vrot.slane %v319_v1, 4  ;;  %v340_v7 = vrot.slane %v339_v2, 4  ;;  %v360_v20 = vrot.slane %v359_v4, 4  ;;  %v380_v21 = vrot.slane %v379_v5, 4 }
  0x54   : > { %v321_v9 = vadd.f32 %v320_v19, %v319_v1  ;;  %v341_v22 = vadd.f32 %v340_v7, %v339_v2  ;;  %v361_v23 = vadd.f32 %v360_v20, %v359_v4  ;;  %v381_v13 = vadd.f32 %v380_v21, %v379_v5 }
  0x56   : > { %v322_v24 = vrot.slane %v321_v9, 2  ;;  %v342_v18 = vrot.slane %v341_v22, 2  ;;  %v362_v25 = vrot.slane %v361_v23, 2  ;;  %v382_v26 = vrot.slane %v381_v13, 2 }
  0x58   : > { %v323_v27 = vadd.f32 %v322_v24, %v321_v9  ;;  %v343_v28 = vadd.f32 %v342_v18, %v341_v22  ;;  %v363_v29 = vadd.f32 %v362_v25, %v361_v23  ;;  %v383_v30 = vadd.f32 %v382_v26, %v381_v13 }
  0x5a   : > { %v324_v31 = vrot.slane %v323_v27, 1  ;;  %v344_v32 = vrot.slane %v343_v28, 1  ;;  %v364_v33 = vrot.slane %v363_v29, 1  ;;  %v384_v34 = vrot.slane %v383_v30, 1 }
  0x5c   : > { %v325_v35 = vadd.f32 %v324_v31, %v323_v27  ;;  %v345_v36 = vadd.f32 %v344_v32, %v343_v28  ;;  %v365_v37 = vadd.f32 %v364_v33, %v363_v29  ;;  %v385_v38 = vadd.f32 %v384_v34, %v383_v30 }
  0x5e   : > { %v397_v39 = vsel %vm396_vm10, %v325_v35, %v345_v36 }
  0x5f   : > { %v398_v40 = vsel %vm318_vm6, %v397_v39, %v365_v37 }
  0x60   : > { %v400_v41 = vsel %vm399_vm11, %v398_v40, %v385_v38 }
  0x61   : > { %v402_v42 = vsel %vm401_vm12, %v400_v41, 0.0 }
  0x62   : > { %404 = vst [vmem:[%s268_s30] sm:$0xff] %v402_v42 }
  0x63   : > { %821 = shalt.err (!%p818_p6)
}
  0x64   : > { %625 = dma.vmem_to_hbm [thread:$0]  (%p960_p9), %s432_s22, 128, %s434_s4, %s413_s15  }
  0x65 PF: > { %s460_s8 = sand.u32 1, %s864_s12   ;;  %p637_p7 = pnand %p596_p12, %p967_p11 }
  0x66   : > { %s461_s28 = scalar_lea.sflag [#allocation4], %s460_s8 }
  0x67   : > { %p638_p8 = pneg %p637_p7 }
  0x69   : > { %855 = dma.done.wait (%p638_p8), %s461_s28, 128  }
  0x6a   : > { %857 = vsyncadd (%p638_p8), %s461_s28, 4294967168  ;;  %s471_s10 = scalar_lea.sflag [#allocation9], %s460_s8 }
  0x6b   : > { %859 = dma.done.wait (%p638_p8), %s471_s10, 128  }
  0x6c   : > { %861 = vsyncadd (%p638_p8), %s471_s10, 4294967168  ;;  %s26_s17 = sadd.s32 1, %s884_s17   ;;  %s1166_s12 = smov %s868_s13 }
  0x6d   : > { %p23_p10 = scmp.ge.s32.totalorder %s26_s17, 4   ;;  %s1167_s13 = smov %s872_s14 }
  0x6e   : > { %s1168_s14 = smov %s965_s26  ;;  %s1169_s15 = smov %s880_s16 }
  0x6f   : > { %s1170_s16 = smov %s1172_s20  ;;  %25 = sbr.rel (!%p23_p10) target bundleno = 10 (0xa), region = 110 }
  0x74   :  { %477 = vsyncpa [#allocation3], 1 }
  0x75   :  { %479 = vsyncpa [#allocation3 + $0x1], 1 }
  0x76   :  { %480 = vsyncpa [#allocation6], 1 }
  0x77   :  { %482 = vsyncpa [#allocation6 + $0x1], 1 }
  0x78   :  { %483 = vsyncpa [#allocation4], 1 }
  0x79   :  { %485 = vsyncpa [#allocation4 + $0x1], 1 }
  0x7a   :  { %486 = vsyncpa [#allocation9], 1 }
  0x7b   :  { %488 = vsyncpa [#allocation9 + $0x1], 1 }

</bundles_post_ra>
